<compile_context>
chip_gen: v7x
topology: tpu7x:2x2x1
jax: 0.10.0
libtpu: 0.0.40
codegen_flags: <defaults>
</compile_context>

<pallas_src>
import jax
import jax.numpy as jnp
from jax.experimental import pallas as pl
from jax.experimental.pallas import tpu as pltpu

_TB_DEFAULT = 2048         # batch tile; sweep {1024, 2048, 4096} for production
_NEG_INF = -1e9            # fill for padded class logits


def _round_up(x, m):
    return (x + m - 1) // m * m


def _choose_tb(b_pad, tb_max):
    """Pick the batch tile. Prefer >=2 grid steps (v7x megacore: both TCs get
    work) while never exceeding tb_max; always a multiple of 8 (sublanes)."""
    if b_pad < 16:
        return b_pad
    half = _round_up((b_pad + 1) // 2, 8)
    return min(tb_max, half)


def lenet_kernel(x_ref, w1_ref, b1_ref, w2_ref, b2_ref, w3_ref, b3_ref, o_ref):
    # x tile arrives as f32 straight from HBM; cast to bf16 in-kernel (VPU op,
    # off the DMA/MXU critical path) instead of a separate wrapper-side pass.
    x = x_ref[...].astype(jnp.bfloat16)

    # fc1 + ReLU : (TB, 784)bf16 @ (784, 384)bf16 -> f32 acc, bias/relu in f32
    h1 = jnp.dot(x, w1_ref[...], preferred_element_type=jnp.float32)
    h1 = jnp.maximum(h1 + b1_ref[...], 0.0)

    # fc2 + ReLU : (TB, 384)bf16 @ (384, 128)bf16 -> f32 acc
    h2 = jnp.dot(h1.astype(jnp.bfloat16), w2_ref[...],
                 preferred_element_type=jnp.float32)
    h2 = jnp.maximum(h2 + b2_ref[...], 0.0)

    # fc3        : (TB, 128)bf16 @ (128, 128)bf16 -> f32 acc
    logits = jnp.dot(h2.astype(jnp.bfloat16), w3_ref[...],
                     preferred_element_type=jnp.float32)
    logits = logits + b3_ref[...]          # padded lanes get -1e9 from b3

    # log_softmax over the class axis (numerically stable, f32). Padded lanes
    # contribute exp(-1e9 - m) == 0 to the normalizer. exp -> EUP, max/sum ->
    # XLU: free filler under the memory-bound regime.
    m = jnp.max(logits, axis=1, keepdims=True)
    shifted = logits - m
    lse = jnp.log(jnp.sum(jnp.exp(shifted), axis=1, keepdims=True))
    o_ref[...] = (shifted - lse).astype(o_ref.dtype)


def prepare_params(params):
    """One-time prep: transpose (out,in)->(in,out), pad to 128-lane multiples,
    cast matmul operands to bf16. Do this once outside the per-call path."""
    w1, b1, w2, b2, w3, b3 = params

    def pad2(a, rows, cols):
        return jnp.pad(a, ((0, rows - a.shape[0]), (0, cols - a.shape[1])))

    w1t = pad2(w1.T.astype(jnp.float32), 784, 384).astype(jnp.bfloat16)
    w2t = pad2(w2.T.astype(jnp.float32), 384, 128).astype(jnp.bfloat16)
    w3t = pad2(w3.T.astype(jnp.float32), 128, 128).astype(jnp.bfloat16)

    b1p = jnp.pad(b1.astype(jnp.float32), (0, 384 - 300)).reshape(1, 384)
    b2p = jnp.pad(b2.astype(jnp.float32), (0, 128 - 100)).reshape(1, 128)
    # Padded class lanes get a huge negative bias so they vanish in log_softmax.
    b3p = jnp.pad(b3.astype(jnp.float32), (0, 128 - 10),
                  constant_values=_NEG_INF).reshape(1, 128)
    return (w1t, b1p, w2t, b2p, w3t, b3p)


def lenet_300_100_forward(x_nchw, prepped_params, *, tb=_TB_DEFAULT,
                          out_dtype=jnp.float32, x_buffers=2):
    """x_nchw: (B, 1, 28, 28) float32. Returns (B, 10) log-probabilities.

    out_dtype=jnp.bfloat16 halves output writeback (fine for argmax/inference).
    x_buffers=3 deepens the streamed-x pipeline (recommended on v5e only).
    """
    w1t, b1p, w2t, b2p, w3t, b3p = prepped_params
    B = x_nchw.shape[0]
    x = x_nchw.reshape(B, 784)          # x.view(-1, 784); free, no dtype change

    # Pad the batch only to a sublane multiple of 8 (usually a no-op), NOT to a
    # multiple of TB — the last grid block may be ragged and Pallas clips the
    # OOB rows on both the read and the (masked) store.
    B_pad = _round_up(B, 8)
    if B_pad != B:
        x = jnp.pad(x, ((0, B_pad - B), (0, 0)))

    TB = _choose_tb(B_pad, tb)
    grid = pl.cdiv(B_pad, TB)

    x_spec_kwargs = {}
    if x_buffers != 2:                  # default double-buffering needs no hint
        x_spec_kwargs["pipeline_mode"] = pl.Buffered(x_buffers)
    x_spec = pl.BlockSpec((TB, 784), lambda i: (i, 0), **x_spec_kwargs)

    resident = lambda shape: pl.BlockSpec(shape, lambda i: (0, 0))

    out = pl.pallas_call(
        lenet_kernel,
        out_shape=jax.ShapeDtypeStruct((B_pad, 128), out_dtype),
        grid=(grid,),
        in_specs=[
            x_spec,                                      # streamed f32 x tiles
            resident(w1t.shape), resident(b1p.shape),    # VMEM-resident weights
            resident(w2t.shape), resident(b2p.shape),
            resident(w3t.shape), resident(b3p.shape),
        ],
        out_specs=pl.BlockSpec((TB, 128), lambda i: (i, 0)),  # lane-dense store
        compiler_params=pltpu.CompilerParams(
            dimension_semantics=("parallel",)),              # megacore on v7x
    )(x, w1t, b1p, w2t, b2p, w3t, b3p)

    return out[:B, :10]


def init_params(key):
    """Deterministic synthetic init matching nn.Linear shapes (out, in)."""
    ks = jax.random.split(key, 6)

    def lin(kw, kb, fan_in, fan_out):
        bound = 1.0 / jnp.sqrt(fan_in)
        w = jax.random.uniform(kw, (fan_out, fan_in), jnp.float32, -bound, bound)
        b = jax.random.uniform(kb, (fan_out,), jnp.float32, -bound, bound)
        return w, b

    w1, b1 = lin(ks[0], ks[1], 784, 300)
    w2, b2 = lin(ks[2], ks[3], 300, 100)
    w3, b3 = lin(ks[4], ks[5], 100, 10)
    return (w1, b1, w2, b2, w3, b3)


def _reference_forward(x_nchw, params):
    """Pure-JAX f32 reference mirroring the PyTorch module."""
    w1, b1, w2, b2, w3, b3 = params
    x = x_nchw.reshape(x_nchw.shape[0], 784).astype(jnp.float32)
    h1 = jnp.maximum(x @ w1.T + b1, 0.0)
    h2 = jnp.maximum(h1 @ w2.T + b2, 0.0)
    logits = h2 @ w3.T + b3
    return jax.nn.log_softmax(logits, axis=1)


if __name__ == "__main__":
    key = jax.random.PRNGKey(0)
    k_param, k_x, k_x2 = jax.random.split(key, 3)
    params = init_params(k_param)
    prepped = prepare_params(params)

    # Small MNIST-like batch: (B=2, C=1, H=28, W=28), NCHW like PyTorch.
    x = jax.random.normal(k_x, (2, 1, 28, 28), dtype=jnp.float32)
    out = jax.block_until_ready(lenet_300_100_forward(x, prepped))

    assert out.shape == (2, 10)
    probs_sum = jnp.sum(jnp.exp(out), axis=1)
    assert bool(jnp.all(jnp.abs(probs_sum - 1.0) < 1e-4))
    ref = _reference_forward(x, params)
    assert bool(jnp.all(jnp.abs(out - ref) < 2e-2))

    # Second check exercising the multi-step grid + ragged last block path
    # (B=20 -> B_pad=24, TB=16, grid=2 with a clipped final block).
    x2 = jax.random.normal(k_x2, (20, 1, 28, 28), dtype=jnp.float32)
    out2 = jax.block_until_ready(lenet_300_100_forward(x2, prepped))
    assert out2.shape == (20, 10)
    probs_sum2 = jnp.sum(jnp.exp(out2), axis=1)
    assert bool(jnp.all(jnp.abs(probs_sum2 - 1.0) < 1e-4))
    ref2 = _reference_forward(x2, params)
    assert bool(jnp.all(jnp.abs(out2 - ref2) < 2e-2))

    print("KERNEL_OK")
</pallas_src>

<mosaic_0001>
module attributes {stable_mosaic.version = 11 : i64} {
  func.func @lenet_kernel(%arg0: i32, %arg1: memref<8x784xf32, #tpu.memory_space<vmem>>, %arg2: memref<784x384xbf16, #tpu.memory_space<vmem>>, %arg3: memref<1x384xf32, #tpu.memory_space<vmem>>, %arg4: memref<384x128xbf16, #tpu.memory_space<vmem>>, %arg5: memref<1x128xf32, #tpu.memory_space<vmem>>, %arg6: memref<128x128xbf16, #tpu.memory_space<vmem>>, %arg7: memref<1x128xf32, #tpu.memory_space<vmem>>, %arg8: memref<8x128xf32, #tpu.memory_space<vmem>>) attributes {dimension_semantics = [#tpu.dimension_semantics<parallel>], iteration_bounds = array<i64: 1>, scalar_prefetch = 0 : i64, scratch_operands = 0 : i64, tpu.core_type = #tpu.core_type<tc>, window_params = [{transform_indices = @transform_0, window_bounds = array<i64: 8, 784>}, {pipeline_mode = #tpu.pipeline_mode<synchronous>, transform_indices = @transform_1, window_bounds = array<i64: 784, 384>}, {pipeline_mode = #tpu.pipeline_mode<synchronous>, transform_indices = @transform_2, window_bounds = array<i64: 1, 384>}, {pipeline_mode = #tpu.pipeline_mode<synchronous>, transform_indices = @transform_3, window_bounds = array<i64: 384, 128>}, {pipeline_mode = #tpu.pipeline_mode<synchronous>, transform_indices = @transform_4, window_bounds = array<i64: 1, 128>}, {pipeline_mode = #tpu.pipeline_mode<synchronous>, transform_indices = @transform_5, window_bounds = array<i64: 128, 128>}, {pipeline_mode = #tpu.pipeline_mode<synchronous>, transform_indices = @transform_6, window_bounds = array<i64: 1, 128>}, {transform_indices = @transform_7, window_bounds = array<i64: 8, 128>}]} {
    %c0 = arith.constant 0 : index
    %c0_0 = arith.constant 0 : index
    %0 = vector.load %arg1[%c0, %c0_0] : memref<8x784xf32, #tpu.memory_space<vmem>>, vector<8x784xf32>
    %1 = arith.truncf %0 : vector<8x784xf32> to vector<8x784xbf16>
    %c0_1 = arith.constant 0 : index
    %c0_2 = arith.constant 0 : index
    %2 = vector.load %arg2[%c0_1, %c0_2] : memref<784x384xbf16, #tpu.memory_space<vmem>>, vector<784x384xbf16>
    %cst = arith.constant dense<0.000000e+00> : vector<8x384xf32>
    %3 = tpu.matmul %1, %2, %cst {dimension_numbers = #tpu.dot_dimension_numbers<[1], [0], [0], [1], [0, 0, 1, 1], [], []>} : vector<8x784xbf16>, vector<784x384xbf16>, vector<8x384xf32> -> vector<8x384xf32>
    %c0_3 = arith.constant 0 : index
    %c0_4 = arith.constant 0 : index
    %4 = vector.load %arg3[%c0_3, %c0_4] : memref<1x384xf32, #tpu.memory_space<vmem>>, vector<1x384xf32>
    %5 = vector.broadcast %4 : vector<1x384xf32> to vector<8x384xf32>
    %6 = arith.addf %3, %5 : vector<8x384xf32>
    %cst_5 = arith.constant 0.000000e+00 : f32
    %7 = vector.broadcast %cst_5 : f32 to vector<8x384xf32>
    %8 = arith.maximumf %6, %7 : vector<8x384xf32>
    %9 = arith.truncf %8 : vector<8x384xf32> to vector<8x384xbf16>
    %c0_6 = arith.constant 0 : index
    %c0_7 = arith.constant 0 : index
    %10 = vector.load %arg4[%c0_6, %c0_7] : memref<384x128xbf16, #tpu.memory_space<vmem>>, vector<384x128xbf16>
    %cst_8 = arith.constant dense<0.000000e+00> : vector<8x128xf32>
    %11 = tpu.matmul %9, %10, %cst_8 {dimension_numbers = #tpu.dot_dimension_numbers<[1], [0], [0], [1], [0, 0, 1, 1], [], []>} : vector<8x384xbf16>, vector<384x128xbf16>, vector<8x128xf32> -> vector<8x128xf32>
    %c0_9 = arith.constant 0 : index
    %c0_10 = arith.constant 0 : index
    %12 = vector.load %arg5[%c0_9, %c0_10] : memref<1x128xf32, #tpu.memory_space<vmem>>, vector<1x128xf32>
    %13 = vector.broadcast %12 : vector<1x128xf32> to vector<8x128xf32>
    %14 = arith.addf %11, %13 : vector<8x128xf32>
    %cst_11 = arith.constant 0.000000e+00 : f32
    %15 = vector.broadcast %cst_11 : f32 to vector<8x128xf32>
    %16 = arith.maximumf %14, %15 : vector<8x128xf32>
    %17 = arith.truncf %16 : vector<8x128xf32> to vector<8x128xbf16>
    %c0_12 = arith.constant 0 : index
    %c0_13 = arith.constant 0 : index
    %18 = vector.load %arg6[%c0_12, %c0_13] : memref<128x128xbf16, #tpu.memory_space<vmem>>, vector<128x128xbf16>
    %cst_14 = arith.constant dense<0.000000e+00> : vector<8x128xf32>
    %19 = tpu.matmul %17, %18, %cst_14 {dimension_numbers = #tpu.dot_dimension_numbers<[1], [0], [0], [1], [0, 0, 1, 1], [], []>} : vector<8x128xbf16>, vector<128x128xbf16>, vector<8x128xf32> -> vector<8x128xf32>
    %c0_15 = arith.constant 0 : index
    %c0_16 = arith.constant 0 : index
    %20 = vector.load %arg7[%c0_15, %c0_16] : memref<1x128xf32, #tpu.memory_space<vmem>>, vector<1x128xf32>
    %21 = vector.broadcast %20 : vector<1x128xf32> to vector<8x128xf32>
    %22 = arith.addf %19, %21 : vector<8x128xf32>
    %cst_17 = arith.constant dense<0xFF800000> : vector<8xf32>
    %23 = vector.multi_reduction <maximumf>, %22, %cst_17 [1] : vector<8x128xf32> to vector<8xf32>
    %24 = vector.shape_cast %23 : vector<8xf32> to vector<8x1xf32>
    %25 = vector.broadcast %24 : vector<8x1xf32> to vector<8x128xf32>
    %26 = arith.subf %22, %25 : vector<8x128xf32>
    %27 = math.exp %26 : vector<8x128xf32>
    %cst_18 = arith.constant dense<0.000000e+00> : vector<8xf32>
    %28 = vector.multi_reduction <add>, %27, %cst_18 [1] : vector<8x128xf32> to vector<8xf32>
    %29 = vector.shape_cast %28 : vector<8xf32> to vector<8x1xf32>
    %30 = math.log %29 : vector<8x1xf32>
    %31 = vector.broadcast %30 : vector<8x1xf32> to vector<8x128xf32>
    %32 = arith.subf %26, %31 : vector<8x128xf32>
    %c0_19 = arith.constant 0 : index
    %c0_20 = arith.constant 0 : index
    %33 = vector.load %arg8[%c0_19, %c0_20] : memref<8x128xf32, #tpu.memory_space<vmem>>, vector<8x128xf32>
    tpu.vector_store %arg8[%c0_19, %c0_20], %32 {strides = array<i32>} : memref<8x128xf32, #tpu.memory_space<vmem>>, vector<8x128xf32>,
    return
  }
  func.func @transform_0(%arg0: i32) -> (i32, i32) {
    %c0_i32 = arith.constant 0 : i32
    %c0_i32_0 = arith.constant 0 : i32
    return %arg0, %c0_i32 : i32, i32
  }
  func.func @transform_1(%arg0: i32) -> (i32, i32) {
    %c0_i32 = arith.constant 0 : i32
    %c0_i32_0 = arith.constant 0 : i32
    %c0_i32_1 = arith.constant 0 : i32
    return %c0_i32, %c0_i32_0 : i32, i32
  }
  func.func @transform_2(%arg0: i32) -> (i32, i32) {
    %c0_i32 = arith.constant 0 : i32
    %c0_i32_0 = arith.constant 0 : i32
    %c0_i32_1 = arith.constant 0 : i32
    return %c0_i32, %c0_i32_0 : i32, i32
  }
  func.func @transform_3(%arg0: i32) -> (i32, i32) {
    %c0_i32 = arith.constant 0 : i32
    %c0_i32_0 = arith.constant 0 : i32
    %c0_i32_1 = arith.constant 0 : i32
    return %c0_i32, %c0_i32_0 : i32, i32
  }
  func.func @transform_4(%arg0: i32) -> (i32, i32) {
    %c0_i32 = arith.constant 0 : i32
    %c0_i32_0 = arith.constant 0 : i32
    %c0_i32_1 = arith.constant 0 : i32
    return %c0_i32, %c0_i32_0 : i32, i32
  }
  func.func @transform_5(%arg0: i32) -> (i32, i32) {
    %c0_i32 = arith.constant 0 : i32
    %c0_i32_0 = arith.constant 0 : i32
    %c0_i32_1 = arith.constant 0 : i32
    return %c0_i32, %c0_i32_0 : i32, i32
  }
  func.func @transform_6(%arg0: i32) -> (i32, i32) {
    %c0_i32 = arith.constant 0 : i32
    %c0_i32_0 = arith.constant 0 : i32
    %c0_i32_1 = arith.constant 0 : i32
    return %c0_i32, %c0_i32_0 : i32, i32
  }
  func.func @transform_7(%arg0: i32) -> (i32, i32) {
    %c0_i32 = arith.constant 0 : i32
    %c0_i32_0 = arith.constant 0 : i32
    return %arg0, %c0_i32 : i32, i32
  }
}

</mosaic_0001>

<bundles_post_ra>
// kernel: tpu_custom_call.1
= control target key start
LH: loop header
LB: loop body
LE: loop exit
PB: predicated region body
PF: predicated region fallthrough
CT: control target
= control target key end

     0   :  { %12 = vsyncpa [#allocation3], 0  ;;  %s2717_s0 = inlined_call_operand.hbm [shape: f32[8,784], index: 0, kind: input, shape index: {}]   ;;  %s2718_s1 = inlined_call_operand.hbm [shape: bf16[784,384], index: 1, kind: input, shape index: {}]   ;;  %s2719_s2 = inlined_call_operand.vmem [shape: f32[1,384], index: 2, kind: input, shape index: {}]   ;;  %s2720_s3 = inlined_call_operand.hbm [shape: bf16[384,128], index: 3, kind: input, shape index: {}]   ;;  %s2721_s4 = inlined_call_operand.vmem [shape: f32[1,128], index: 4, kind: input, shape index: {}]   ;;  %s2722_s5 = inlined_call_operand.hbm [shape: bf16[128,128], index: 5, kind: input, shape index: {}]   ;;  %s2723_s6 = inlined_call_operand.vmem [shape: f32[1,128], index: 6, kind: input, shape index: {}]   ;;  %s2724_s7 = inlined_call_operand.hbm [shape: f32[8,128], index: 7, kind: output, shape index: {}]  }
   0x1   :  { %13 = vsyncpa [#allocation6], 0 }
   0x2   :  { %14 = vsyncpa [#allocation9], 0 }
   0x3   :  { %15 = vsyncpa [#allocation4], 0  ;;  %s2559_s24 = smov [#allocation5]   ;;  %s2441_s28 = scalar_lea.hbm %s2718_s1, 18816 }
   0x4   :  { %s31_s25 = sshll.u32 %s2559_s24, 4  ;;  %p2442_p0 = scmp.ne.s32.totalorder %s2718_s1, %s2441_s28  ;;  %s32_s25 = int_to_ptr.vmem [resolvable:$true] %s31_s25 }
   0x5   :  { %p2445_p1 = scmp.lt.u32.totalorder %s2441_s28, %s2718_s1 }
   0x7   :  { %p2447_p2 = pnand %p2445_p1, %p2442_p0 }
   0x9   :  { %2450 = shalt.err (!%p2447_p2)
}
   0xa   :  { %s2451_s10 = scalar_lea.vmem %s32_s25, 18816  ;;  %p2456_p4 = scmp.lt.s32.totalorder %s32_s25, %s32_s25 }
   0xb   :  { %p2452_p3 = scmp.ne.s32.totalorder %s32_s25, %s2451_s10  ;;  %p2457_p5 = scmp.lt.s32.totalorder %s2451_s10, %s2451_s10 }
   0xd   :  { %p2458_p6 = por %p2457_p5, %p2456_p4 }
   0xf   :  { %p2459_p7 = pnand %p2458_p6, %p2452_p3 }
  0x11   :  { %2462 = shalt.err (!%p2459_p7)
}
  0x12   :  { %s2560_s11 = smov 192   ;;  %s2561_s12 = smov 12  }
  0x13   :  { %37 = dma.hbm_to_vmem [thread:$0]  %s2718_s1, 18816, %s32_s25, [#allocation6], %s2560_s11, %s2560_s11, %s2561_s12  }
  0x14   :  { %s2562_s15 = smov [#allocation2]   ;;  %s2563_s17 = smov [#allocation7]  }
  0x15   :  { %s22_s16 = sshll.u32 %s2562_s15, 4  ;;  %s45_s18 = sshll.u32 %s2563_s17, 4  ;;  %s23_s16 = int_to_ptr.vmem [resolvable:$true] %s22_s16  ;;  %s46_s18 = int_to_ptr.vmem [resolvable:$true] %s45_s18 }
  0x16   :  { %s2463_s21 = scalar_lea.hbm %s2717_s0, 896 }
  0x17   :  { %p2464_p8 = scmp.ne.s32.totalorder %s2717_s0, %s2463_s21  ;;  %p2467_p9 = scmp.lt.u32.totalorder %s2463_s21, %s2717_s0 }
  0x19   :  { %p2469_p10 = pnand %p2467_p9, %p2464_p8 }
  0x1b   :  { %2472 = shalt.err (!%p2469_p10)
}
  0x1c   :  { %s2473_s1 = scalar_lea.vmem %s23_s16, 896  ;;  %p2478_p12 = scmp.lt.s32.totalorder %s23_s16, %s23_s16 }
  0x1d   :  { %p2474_p11 = scmp.ne.s32.totalorder %s23_s16, %s2473_s1  ;;  %p2479_p13 = scmp.lt.s32.totalorder %s2473_s1, %s2473_s1 }
  0x1f   :  { %p2480_p0 = por %p2479_p13, %p2478_p12 }
  0x21   :  { %p2481_p1 = pnand %p2480_p0, %p2474_p11 }
  0x23   :  { %2484 = shalt.err (!%p2481_p1)
}
  0x24   :  { %25 = dma.hbm_to_vmem [thread:$0]  %s2717_s0, 896, %s23_s16, [#allocation3]  }
  0x25   :  { %s2485_s30 = scalar_lea.hbm %s2720_s3, 3072 }
  0x26   :  { %p2486_p2 = scmp.ne.s32.totalorder %s2720_s3, %s2485_s30  ;;  %p2489_p3 = scmp.lt.u32.totalorder %s2485_s30, %s2720_s3 }
  0x28   :  { %p2491_p4 = pnand %p2489_p3, %p2486_p2 }
  0x2a   :  { %2494 = shalt.err (!%p2491_p4)
}
  0x2b   :  { %s2495_s12 = scalar_lea.vmem %s46_s18, 3072  ;;  %p2500_p6 = scmp.lt.s32.totalorder %s46_s18, %s46_s18 }
  0x2c   :  { %p2496_p5 = scmp.ne.s32.totalorder %s46_s18, %s2495_s12  ;;  %p2501_p7 = scmp.lt.s32.totalorder %s2495_s12, %s2495_s12 }
  0x2e   :  { %p2502_p8 = por %p2501_p7, %p2500_p6 }
  0x30   :  { %p2503_p9 = pnand %p2502_p8, %p2496_p5 }
  0x32   :  { %2506 = shalt.err (!%p2503_p9)
}
  0x33   :  { %s2564_s0 = smov 64   ;;  %s2565_s13 = smov 4  }
  0x34   :  { %51 = dma.hbm_to_vmem [thread:$0]  %s2720_s3, 3072, %s46_s18, [#allocation6], %s2564_s0, %s2564_s0, %s2565_s13  }
  0x35   :  { %s2566_s16 = smov [#allocation8]   ;;  %s2507_s21 = scalar_lea.hbm %s2722_s5, 1024 }
  0x36   :  { %s59_s17 = sshll.u32 %s2566_s16, 4  ;;  %p2508_p10 = scmp.ne.s32.totalorder %s2722_s5, %s2507_s21  ;;  %s60_s17 = int_to_ptr.vmem [resolvable:$true] %s59_s17 }
  0x37   :  { %p2511_p11 = scmp.lt.u32.totalorder %s2507_s21, %s2722_s5 }
  0x39   :  { %p2513_p12 = pnand %p2511_p11, %p2508_p10 }
  0x3b   :  { %2516 = shalt.err (!%p2513_p12)
}
  0x3c   :  { %s2517_s1 = scalar_lea.vmem %s60_s17, 1024  ;;  %p2522_p0 = scmp.lt.s32.totalorder %s60_s17, %s60_s17 }
  0x3d   :  { %p2518_p13 = scmp.ne.s32.totalorder %s60_s17, %s2517_s1  ;;  %p2523_p1 = scmp.lt.s32.totalorder %s2517_s1, %s2517_s1 }
  0x3f   :  { %p2524_p2 = por %p2523_p1, %p2522_p0 }
  0x41   :  { %p2525_p3 = pnand %p2524_p2, %p2518_p13 }
  0x43   :  { %2528 = shalt.err (!%p2525_p3)
}
  0x44   :  { %65 = dma.hbm_to_vmem [thread:$0]  %s2722_s5, 1024, %s60_s17, [#allocation9], %s2564_s0, %s2564_s0, %s2565_s13  }
  0x45   :  { %2551 = dma.done.wait [#allocation3], 896  }
  0x46   :  { %2552 = vsyncadd [#allocation3], 4294966400 }
  0x47   :  { %2553 = dma.done.wait [#allocation6], 21888  }
  0x48   :  { %2554 = vsyncadd [#allocation6], 4294945408 }
  0x49   :  { %2555 = dma.done.wait [#allocation9], 1024  }
  0x4a   :  { %2556 = vsyncadd [#allocation9], 4294966272  ;;  %v2209_v0 = vld [vmem:[#allocation5 + $0x4] ss:$12 sps:$4 sm:$0xff]   ;;  %v2211_v1 = vld [vmem:[#allocation5] ss:$12 sps:$4 sm:$0xff]  }
  0x4b   :  { %1096 = vmatprep.subr.bf16.mxu0 %v2209_v0  ;;  %v2212_v2 = vld [vmem:[#allocation5 + $0x1c] ss:$12 sps:$4 sm:$0xff]   ;;  %v2214_v3 = vld [vmem:[#allocation5 + $0x18] ss:$12 sps:$4 sm:$0xff]   ;;  %v2215_v4 = vld [vmem:[#allocation5 + $0x34] ss:$12 sps:$4 sm:$0xff]  }
  0x4c   :  { %1097 = vmatpush1.bf16.msra.mxu0 %v2211_v1  ;;  %v2217_v5 = vld [vmem:[#allocation5 + $0x30] ss:$12 sps:$4 sm:$0xff]   ;;  %v2218_v6 = vld [vmem:[#allocation5 + $0x4c] ss:$12 sps:$4 sm:$0xff]   ;;  %v2220_v7 = vld [vmem:[#allocation5 + $0x48] ss:$12 sps:$4 sm:$0xff]  }
  0x4d   :  { %1098 = vmatprep.subr.bf16.mxu0 %v2212_v2  ;;  %v2221_v8 = vld [vmem:[#allocation5 + $0x64] ss:$12 sps:$4 sm:$0xff]   ;;  %v2223_v9 = vld [vmem:[#allocation5 + $0x60] ss:$12 sps:$4 sm:$0xff]   ;;  %v2224_v10 = vld [vmem:[#allocation5 + $0x7c] ss:$12 sps:$4 sm:$0xff]  }
  0x4e   :  { %v2226_v11 = vld [vmem:[#allocation5 + $0x78] ss:$12 sps:$4 sm:$0xff]   ;;  %v2227_v12 = vld [vmem:[#allocation5 + $0x94] ss:$12 sps:$4 sm:$0xff]   ;;  %v2229_v15 = vld [vmem:[#allocation5 + $0x90] ss:$12 sps:$4 sm:$0xff]  }
  0x4f   :  { %v82_v13 = vld [vmem:[#allocation2 + $0x8] sm:$0xff]  ;;  %v2230_v16 = vld [vmem:[#allocation5 + $0xac] ss:$12 sps:$4 sm:$0xff]   ;;  %v2236_v24 = vld [vmem:[#allocation5 + $0xdc] ss:$12 sps:$4 sm:$0xff]   ;;  %vm1092_vm0 = vcmask 130048  }
  0x50   :  { %1099 = vmatpush1.bf16.msra.mxu0 %v2214_v3  ;;  %v89_v14 = vpack.c.bf16 %v82_v13, %v82_v13  ;;  %v2263_v17 = vld [vmem:[#allocation5 + $0xc8] ss:$12 sps:$4 sm:$0xff]   ;;  %v2233_v20 = vld [vmem:[#allocation5 + $0xc4] ss:$12 sps:$4 sm:$0xff]   ;;  %v2268_v21 = vld [vmem:[#allocation5 + $0xe0] ss:$12 sps:$4 sm:$0xff]  }
  0x51   :  { %1100 = vmatprep.subr.bf16.mxu0 %v2215_v4  ;;  %v2264_v18 = vld [vmem:[#allocation5 + $0x8] ss:$12 sps:$4 sm:$0xff]   ;;  %2029 = vmatprep.subr.bf16.mxu1 %v2263_v17  ;;  %v2269_v22 = vld [vmem:[#allocation5 + $0x20] ss:$12 sps:$4 sm:$0xff]   ;;  %v2273_v25 = vld [vmem:[#allocation5 + $0xf8] ss:$12 sps:$4 sm:$0xff]  }
  0x52   :  { %1128 = vmatprep.mubr.bf16.mxu0 %v89_v14  ;;  %1292 = vmatprep.mubr.bf16.mxu1 %v89_v14  ;;  %v2232_v19 = vld [vmem:[#allocation5 + $0xa8] ss:$12 sps:$4 sm:$0xff]   ;;  %v2235_v23 = vld [vmem:[#allocation5 + $0xc0] ss:$12 sps:$4 sm:$0xff]   ;;  %v2274_v26 = vld [vmem:[#allocation5 + $0x38] ss:$12 sps:$4 sm:$0xff]  }
  0x53   :  { %2030 = vmatpush3.bf16.msra.mxu1 %v2264_v18  ;;  %v2238_v27 = vld [vmem:[#allocation5 + $0xd8] ss:$12 sps:$4 sm:$0xff]   ;;  %v2239_v28 = vld [vmem:[#allocation5 + $0xf4] ss:$12 sps:$4 sm:$0xff]   ;;  %v2278_v29 = vld [vmem:[#allocation5 + $0x110] ss:$12 sps:$4 sm:$0xff]  }
  0x54   :  { %1101 = vmatpush1.bf16.msra.mxu0 %v2217_v5  ;;  %2031 = vmatprep.subr.bf16.mxu1 %v2268_v21  ;;  %v2279_v30 = vld [vmem:[#allocation5 + $0x50] ss:$12 sps:$4 sm:$0xff]   ;;  %v2283_v32 = vld [vmem:[#allocation5 + $0x128] ss:$12 sps:$4 sm:$0xff]   ;;  %v2242_v33 = vld [vmem:[#allocation5 + $0x10c] ss:$12 sps:$4 sm:$0xff]  }
  0x55   :  { %1102 = vmatprep.subr.bf16.mxu0 %v2218_v6  ;;  %v2241_v31 = vld [vmem:[#allocation5 + $0xf0] ss:$12 sps:$4 sm:$0xff]   ;;  %v2284_v34 = vld [vmem:[#allocation5 + $0x68] ss:$12 sps:$4 sm:$0xff]   ;;  %v2288_v35 = vld [vmem:[#allocation5 + $0x140] ss:$12 sps:$4 sm:$0xff]  }
  0x56   :  { %v2244_v36 = vld [vmem:[#allocation5 + $0x108] ss:$12 sps:$4 sm:$0xff]   ;;  %v2245_v37 = vld [vmem:[#allocation5 + $0x124] ss:$12 sps:$4 sm:$0xff]   ;;  %v2289_v38 = vld [vmem:[#allocation5 + $0x80] ss:$12 sps:$4 sm:$0xff]  }
  0x57   :  { %2032 = vmatpush3.bf16.msra.mxu1 %v2269_v22  ;;  %v2293_v39 = vld [vmem:[#allocation5 + $0x158] ss:$12 sps:$4 sm:$0xff]   ;;  %v2247_v40 = vld [vmem:[#allocation5 + $0x120] ss:$12 sps:$4 sm:$0xff]   ;;  %v2248_v41 = vld [vmem:[#allocation5 + $0x13c] ss:$12 sps:$4 sm:$0xff]  }
  0x58   :  { %1103 = vmatpush1.bf16.msra.mxu0 %v2220_v7  ;;  %2033 = vmatprep.subr.bf16.mxu1 %v2273_v25  ;;  %v2294_v42 = vld [vmem:[#allocation5 + $0x98] ss:$12 sps:$4 sm:$0xff]   ;;  %v2298_v43 = vld [vmem:[#allocation5 + $0x170] ss:$12 sps:$4 sm:$0xff]   ;;  %v2251_v45 = vld [vmem:[#allocation5 + $0x154] ss:$12 sps:$4 sm:$0xff]  }
  0x59   :  { %1104 = vmatprep.subr.bf16.mxu0 %v2221_v8  ;;  %v2250_v44 = vld [vmem:[#allocation5 + $0x138] ss:$12 sps:$4 sm:$0xff]   ;;  %v2299_v46 = vld [vmem:[#allocation5 + $0xb0] ss:$12 sps:$4 sm:$0xff]   ;;  %v2303_v47 = vld [vmem:[#allocation5 + $0x248] ss:$12 sps:$4 sm:$0xff]  }
  0x5a   :  { %v2253_v48 = vld [vmem:[#allocation5 + $0x150] ss:$12 sps:$4 sm:$0xff]   ;;  %v81_v49 = vld [vmem:[#allocation2] sm:$0xff]  ;;  %v2313_v57 = vld [vmem:[#allocation5 + $0x278] ss:$12 sps:$4 sm:$0xff]   ;;  %vm2568_vm1 = vmmov 0  }
  0x5b   :  { %2034 = vmatpush3.bf16.msra.mxu1 %v2274_v26  ;;  %v2254_v50 = vld [vmem:[#allocation5 + $0x16c] ss:$12 sps:$4 sm:$0xff]   ;;  %v2304_v51 = vld [vmem:[#allocation5 + $0x188] ss:$12 sps:$4 sm:$0xff]   ;;  %v88_v52 = vpack.c.bf16 %v81_v49, %v81_v49  ;;  %v2259_v55 = vld [vmem:[#allocation5 + $0x184] ss:$12 sps:$4 sm:$0xff]  }
  0x5c   :  { %1105 = vmatpush1.bf16.msra.mxu0 %v2223_v9  ;;  %2035 = vmatprep.subr.bf16.mxu1 %v2278_v29  ;;  %v2308_v53 = vld [vmem:[#allocation5 + $0x260] ss:$12 sps:$4 sm:$0xff]   ;;  %v2256_v54 = vld [vmem:[#allocation5 + $0x168] ss:$12 sps:$4 sm:$0xff]   ;;  %v2314_v60 = vld [vmem:[#allocation5 + $0x1b8] ss:$12 sps:$4 sm:$0xff]  }
  0x5d   :  { %1106 = vmatprep.subr.bf16.mxu0 %v2224_v10  ;;  %v2309_v56 = vld [vmem:[#allocation5 + $0x1a0] ss:$12 sps:$4 sm:$0xff]   ;;  %v2262_v59 = vld [vmem:[#allocation5 + $0x19c] ss:$12 sps:$4 sm:$0xff]   ;;  %v2260_v62 = vld [vmem:[#allocation5 + $0x198] ss:$12 sps:$4 sm:$0xff]  }
  0x5e   :  { %v2257_v58 = vld [vmem:[#allocation5 + $0x180] ss:$12 sps:$4 sm:$0xff]   ;;  %v2318_v61 = vld [vmem:[#allocation5 + $0x290] ss:$12 sps:$4 sm:$0xff]   ;;  %v2323_v1 = vld [vmem:[#allocation5 + $0x2a8] ss:$12 sps:$4 sm:$0xff]  }
  0x5f   :  { %2036 = vmatpush3.bf16.msra.mxu1 %v2279_v30  ;;  %v2267_v63 = vld [vmem:[#allocation5 + $0x1b4] ss:$12 sps:$4 sm:$0xff]   ;;  %v2319_v0 = vld [vmem:[#allocation5 + $0x1d0] ss:$12 sps:$4 sm:$0xff]   ;;  %v2272_v3 = vld [vmem:[#allocation5 + $0x1cc] ss:$12 sps:$4 sm:$0xff]  }
  0x60   :  { %1107 = vmatpush1.bf16.msra.mxu0 %v2226_v11  ;;  %2037 = vmatprep.subr.bf16.mxu1 %v2283_v32  ;;  %v2265_v2 = vld [vmem:[#allocation5 + $0x1b0] ss:$12 sps:$4 sm:$0xff]   ;;  %v2324_v4 = vld [vmem:[#allocation5 + $0x1e8] ss:$12 sps:$4 sm:$0xff]   ;;  %v2328_v5 = vld [vmem:[#allocation5 + $0x2c0] ss:$12 sps:$4 sm:$0xff]  }
  0x61   :  { %1108 = vmatprep.subr.bf16.mxu0 %v2227_v12  ;;  %v84_v6 = vld [vmem:[#allocation2 + $0x18] sm:$0xff]  ;;  %v2270_v7 = vld [vmem:[#allocation5 + $0x1c8] ss:$12 sps:$4 sm:$0xff]   ;;  %v2339_v18 = vld [vmem:[#allocation5 + $0x230] ss:$12 sps:$4 sm:$0xff]  }
  0x62   :  { %v91_v8 = vpack.c.bf16 %v84_v6, %v84_v6  ;;  %v2277_v9 = vld [vmem:[#allocation5 + $0x1e4] ss:$12 sps:$4 sm:$0xff]   ;;  %v2329_v10 = vld [vmem:[#allocation5 + $0x200] ss:$12 sps:$4 sm:$0xff]   ;;  %v2282_v13 = vld [vmem:[#allocation5 + $0x1fc] ss:$12 sps:$4 sm:$0xff]  }
  0x63   :  { %2038 = vmatpush3.bf16.msra.mxu1 %v2284_v34  ;;  %v2333_v11 = vld [vmem:[#allocation5 + $0x2d8] ss:$12 sps:$4 sm:$0xff]   ;;  %v2275_v12 = vld [vmem:[#allocation5 + $0x1e0] ss:$12 sps:$4 sm:$0xff]   ;;  %v2285_v21 = vld [vmem:[#allocation5 + $0x210] ss:$12 sps:$4 sm:$0xff]  }
  0x64   :  { %1109 = vmatpush1.bf16.msra.mxu0 %v2229_v15  ;;  %2039 = vmatprep.subr.bf16.mxu1 %v2288_v35  ;;  %v2334_v14 = vld [vmem:[#allocation5 + $0x218] ss:$12 sps:$4 sm:$0xff]   ;;  %v2338_v15 = vld [vmem:[#allocation5 + $0x2f0] ss:$12 sps:$4 sm:$0xff]   ;;  %v2287_v17 = vld [vmem:[#allocation5 + $0x214] ss:$12 sps:$4 sm:$0xff]  }
  0x65   :  { %1110 = vmatprep.subr.bf16.mxu0 %v2230_v16  ;;  %v2280_v16 = vld [vmem:[#allocation5 + $0x1f8] ss:$12 sps:$4 sm:$0xff]   ;;  %v2348_v25 = vld [vmem:[#allocation5 + $0x3e0] ss:$12 sps:$4 sm:$0xff]   ;;  %v2290_v26 = vld [vmem:[#allocation5 + $0x228] ss:$12 sps:$4 sm:$0xff]  }
  0x66   :  { %v2292_v22 = vld [vmem:[#allocation5 + $0x22c] ss:$12 sps:$4 sm:$0xff]   ;;  %v2307_v35 = vld [vmem:[#allocation5 + $0x274] ss:$12 sps:$4 sm:$0xff]   ;;  %v2322_v49 = vld [vmem:[#allocation5 + $0x2bc] ss:$12 sps:$4 sm:$0xff]  }
  0x67   :  { %2040 = vmatpush3.bf16.msra.mxu1 %v2289_v38  ;;  %v2353_v29 = vld [vmem:[#allocation5 + $0x3f8] ss:$12 sps:$4 sm:$0xff]   ;;  %v2295_v30 = vld [vmem:[#allocation5 + $0x240] ss:$12 sps:$4 sm:$0xff]   ;;  %v2305_v38 = vld [vmem:[#allocation5 + $0x270] ss:$12 sps:$4 sm:$0xff]  }
  0x68   :  { %1111 = vmatpush1.bf16.msra.mxu0 %v2232_v19  ;;  %2041 = vmatprep.subr.bf16.mxu1 %v2293_v39  ;;  %v2343_v19 = vld [vmem:[#allocation5 + $0x3c8] ss:$12 sps:$4 sm:$0xff]   ;;  %v2354_v32 = vld [vmem:[#allocation5 + $0x338] ss:$12 sps:$4 sm:$0xff]  }
  0x69   :  { %1112 = vmatprep.subr.bf16.mxu0 %v2233_v20  ;;  %v83_v20 = vld [vmem:[#allocation2 + $0x10] sm:$0xff] }
  0x6a   :  { %v2300_v34 = vld [vmem:[#allocation5 + $0x258] ss:$12 sps:$4 sm:$0xff]  }
  0x6b   :  { %2042 = vmatpush3.bf16.msra.mxu1 %v2294_v42  ;;  %v2312_v39 = vld [vmem:[#allocation5 + $0x28c] ss:$12 sps:$4 sm:$0xff]   ;;  %v86_v42 = vld [vmem:[#allocation2 + $0x28] sm:$0xff] }
  0x6c   :  { %1113 = vmatpush1.bf16.msra.mxu0 %v2235_v23  ;;  %2043 = vmatprep.subr.bf16.mxu1 %v2298_v43  ;;  %v2344_v23 = vld [vmem:[#allocation5 + $0x308] ss:$12 sps:$4 sm:$0xff]   ;;  %v2352_v6 = vld [vmem:[#allocation5 + $0x34c] ss:$12 sps:$4 sm:$0xff]  }
  0x6d   :  { %1114 = vmatprep.subr.bf16.mxu0 %v2236_v24  ;;  %v2659_v24 = vpack.c.bf16 %v83_v20, %v83_v20  ;;  %v2310_v43 = vld [vmem:[#allocation5 + $0x288] ss:$12 sps:$4 sm:$0xff]  }
  0x6e   :  { %v2385_v20 = vld [vmem:[#allocation5 + $0x3f4] ss:$12 sps:$4 sm:$0xff]  }
  0x6f   :  { %2044 = vmatpush3.bf16.msra.mxu1 %v2299_v46  ;;  %v2369_v46 = vld [vmem:[#allocation5 + $0x380] ss:$12 sps:$4 sm:$0xff]  }
  0x70   :  { %1115 = vmatpush1.bf16.msra.mxu0 %v2238_v27  ;;  %2051 = vmatprep.subr.bf16.mxu1 %v2303_v47  ;;  %v2297_v27 = vld [vmem:[#allocation5 + $0x244] ss:$12 sps:$4 sm:$0xff]  }
  0x71   :  { %1116 = vmatprep.subr.bf16.mxu0 %v2239_v28  ;;  %v2349_v28 = vld [vmem:[#allocation5 + $0x320] ss:$12 sps:$4 sm:$0xff]   ;;  %v2373_v47 = vld [vmem:[#allocation5 + $0x458] ss:$12 sps:$4 sm:$0xff]  }
  0x72   :  { %1293 = vmatmul.mubr.bf16.vlgmr.msra.gmra.mrb[0].mxu1 %v88_v52 }
  0x73   :  { %2052 = vmatpush3.bf16.msra.mxu1 %v2304_v51  ;;  %1332 = vmatprep.mubr.bf16.mxu1 %v91_v8  ;;  %v2378_v51 = vld [vmem:[#allocation5 + $0x470] ss:$12 sps:$4 sm:$0xff]  }
  0x74   :  { %1117 = vmatpush1.bf16.msra.mxu0 %v2241_v31  ;;  %2053 = vmatprep.subr.bf16.mxu1 %v2308_v53  ;;  %v2302_v31 = vld [vmem:[#allocation5 + $0x25c] ss:$12 sps:$4 sm:$0xff]   ;;  %v2327_v53 = vld [vmem:[#allocation5 + $0x2d4] ss:$12 sps:$4 sm:$0xff]  }
  0x75   :  { %1118 = vmatprep.subr.bf16.mxu0 %v2242_v33  ;;  %v2358_v33 = vld [vmem:[#allocation5 + $0x410] ss:$12 sps:$4 sm:$0xff]  }
  0x77   :  { %2054 = vmatpush3.bf16.msra.mxu1 %v2309_v56  ;;  %v2325_v56 = vld [vmem:[#allocation5 + $0x2d0] ss:$12 sps:$4 sm:$0xff]  }
  0x78   :  { %1119 = vmatpush1.bf16.msra.mxu0 %v2244_v36  ;;  %2055 = vmatprep.subr.bf16.mxu1 %v2313_v57  ;;  %v2359_v36 = vld [vmem:[#allocation5 + $0x350] ss:$12 sps:$4 sm:$0xff]   ;;  %v2332_v57 = vld [vmem:[#allocation5 + $0x2ec] ss:$12 sps:$4 sm:$0xff]  }
  0x79   :  { %1120 = vmatprep.subr.bf16.mxu0 %v2245_v37  ;;  %v2363_v37 = vld [vmem:[#allocation5 + $0x428] ss:$12 sps:$4 sm:$0xff]  }
  0x7b   :  { %2056 = vmatpush3.bf16.msra.mxu1 %v2314_v60  ;;  %v2330_v60 = vld [vmem:[#allocation5 + $0x2e8] ss:$12 sps:$4 sm:$0xff]  }
  0x7c   :  { %1121 = vmatpush1.bf16.msra.mxu0 %v2247_v40  ;;  %2057 = vmatprep.subr.bf16.mxu1 %v2318_v61  ;;  %v2364_v40 = vld [vmem:[#allocation5 + $0x368] ss:$12 sps:$4 sm:$0xff]   ;;  %v2567_v61 = vmov 0.0  }
  0x7d   :  { %1122 = vmatprep.subr.bf16.mxu0 %v2248_v41  ;;  %v2368_v41 = vld [vmem:[#allocation5 + $0x440] ss:$12 sps:$4 sm:$0xff]  }
  0x7f   :  { %2058 = vmatpush3.bf16.msra.mxu1 %v2319_v0  ;;  %v2335_v0 = vld [vmem:[#allocation5 + $0x300] ss:$12 sps:$4 sm:$0xff]  }
  0x80   :  { %1123 = vmatpush1.bf16.msra.mxu0 %v2250_v44  ;;  %2059 = vmatprep.subr.bf16.mxu1 %v2323_v1  ;;  %v93_v44 = vpack.c.bf16 %v86_v42, %v86_v42  ;;  %v2342_v1 = vld [vmem:[#allocation5 + $0x31c] ss:$12 sps:$4 sm:$0xff]   ;;  %v2412_v42 = vld [vmem:[#allocation7 + $0x18] sm:$0xff]  }
  0x81   :  { %1124 = vmatprep.subr.bf16.mxu0 %v2251_v45  ;;  %v2317_v45 = vld [vmem:[#allocation5 + $0x2a4] ss:$12 sps:$4 sm:$0xff]  }
  0x83   :  { %2060 = vmatpush3.bf16.msra.mxu1 %v2324_v4  ;;  %v2347_v4 = vld [vmem:[#allocation5 + $0x334] ss:$12 sps:$4 sm:$0xff]  }
  0x84   :  { %1125 = vmatpush1.bf16.msra.mxu0 %v2253_v48  ;;  %2061 = vmatprep.subr.bf16.mxu1 %v2328_v5  ;;  %v2315_v48 = vld [vmem:[#allocation5 + $0x2a0] ss:$12 sps:$4 sm:$0xff]   ;;  %v2345_v5 = vld [vmem:[#allocation5 + $0x330] ss:$12 sps:$4 sm:$0xff]  }
  0x85   :  { %1126 = vmatprep.subr.bf16.mxu0 %v2254_v50  ;;  %v2374_v50 = vld [vmem:[#allocation5 + $0x398] ss:$12 sps:$4 sm:$0xff]  }
  0x87   :  { %2062 = vmatpush3.bf16.msra.mxu1 %v2329_v10  ;;  %v2362_v10 = vld [vmem:[#allocation5 + $0x37c] ss:$12 sps:$4 sm:$0xff]  }
  0x88   :  { %1127 = vmatpush1.bf16.msra.mxu0 %v2256_v54  ;;  %2063 = vmatprep.subr.bf16.mxu1 %v2333_v11  ;;  %v2379_v54 = vld [vmem:[#allocation5 + $0x3b0] ss:$12 sps:$4 sm:$0xff]   ;;  %v2360_v11 = vld [vmem:[#allocation5 + $0x378] ss:$12 sps:$4 sm:$0xff]  }
  0x89   :  { %1137 = vmatprep.subr.bf16.mxu0 %v2259_v55  ;;  %v85_v55 = vld [vmem:[#allocation2 + $0x20] sm:$0xff] }
  0x8b   :  { %1129 = vmatmul.mubr.bf16.vlgmr.msra.gmra.mrb[0].mxu0 %v88_v52  ;;  %2064 = vmatpush3.bf16.msra.mxu1 %v2334_v14  ;;  %v2320_v52 = vld [vmem:[#allocation5 + $0x2b8] ss:$12 sps:$4 sm:$0xff]  }
  0x8c   :  { %1138 = vmatpush1.bf16.msra.mxu0 %v2257_v58  ;;  %1169 = vmatprep.mubr.bf16.mxu0 %v91_v8  ;;  %v2386_v58 = vld [vmem:[#allocation5 + $0x488] ss:$12 sps:$4 sm:$0xff]   ;;  %v2357_v8 = vld [vmem:[#allocation5 + $0x364] ss:$12 sps:$4 sm:$0xff]   ;;  %v2372_v14 = vld [vmem:[#allocation5 + $0x3ac] ss:$12 sps:$4 sm:$0xff]  }
  0x8d   :  { %1139 = vmatprep.subr.bf16.mxu0 %v2262_v59  ;;  %2065 = vmatprep.subr.bf16.mxu1 %v2338_v15  ;;  %v2662_v59 = vpack.c.bf16 %v85_v55, %v85_v55  ;;  %v2370_v15 = vld [vmem:[#allocation5 + $0x3a8] ss:$12 sps:$4 sm:$0xff]  }
  0x8f   :  { %2066 = vmatpush3.bf16.msra.mxu1 %v2339_v18  ;;  %v2382_v18 = vld [vmem:[#allocation5 + $0x3dc] ss:$12 sps:$4 sm:$0xff]  }
  0x90   :  { %1140 = vmatpush1.bf16.msra.mxu0 %v2260_v62  ;;  %2073 = vmatprep.subr.bf16.mxu1 %v2343_v19  ;;  %v2337_v62 = vld [vmem:[#allocation5 + $0x304] ss:$12 sps:$4 sm:$0xff]  }
  0x91   :  { %1141 = vmatprep.subr.bf16.mxu0 %v2267_v63  ;;  %v87_v63 = vld [vmem:[#allocation2 + $0x30] sm:$0xff] }
  0x92   :  { %1333 = vmatmul.mubr.bf16.vlgmr.msra.gmra.mrb[4].mxu1 %v2659_v24  ;;  %v2380_v19 = vld [vmem:[#allocation5 + $0x3d8] ss:$12 sps:$4 sm:$0xff]  }
  0x93   :  { %2074 = vmatpush3.bf16.msra.mxu1 %v2344_v23  ;;  %1372 = vmatprep.mubr.bf16.mxu1 %v93_v44  ;;  %v2387_v23 = vld [vmem:[#allocation5 + $0x408] ss:$12 sps:$4 sm:$0xff]  }
  0x94   :  { %1142 = vmatpush1.bf16.msra.mxu0 %v2265_v2  ;;  %2075 = vmatprep.subr.bf16.mxu1 %v2348_v25  ;;  %v2668_v2 = vpack.c.bf16 %v87_v63, %v87_v63  ;;  %v2390_v25 = vld [vmem:[#allocation5 + $0x420] ss:$12 sps:$4 sm:$0xff]  }
  0x95   :  { %1143 = vmatprep.subr.bf16.mxu0 %v2272_v3  ;;  %v2340_v3 = vld [vmem:[#allocation5 + $0x318] ss:$12 sps:$4 sm:$0xff]  }
  0x97   :  { %2076 = vmatpush3.bf16.msra.mxu1 %v2349_v28  ;;  %v2398_v28 = vld [vmem:[#allocation5 + $0x454] ss:$12 sps:$4 sm:$0xff]  }
  0x98   :  { %1144 = vmatpush1.bf16.msra.mxu0 %v2270_v7  ;;  %2077 = vmatprep.subr.bf16.mxu1 %v2353_v29  ;;  %v2350_v7 = vld [vmem:[#allocation5 + $0x348] ss:$12 sps:$4 sm:$0xff]   ;;  %v2396_v29 = vld [vmem:[#allocation5 + $0x450] ss:$12 sps:$4 sm:$0xff]  }
  0x99   :  { %1145 = vmatprep.subr.bf16.mxu0 %v2277_v9  ;;  %v2355_v9 = vld [vmem:[#allocation5 + $0x360] ss:$12 sps:$4 sm:$0xff]  }
  0x9b   :  { %2078 = vmatpush3.bf16.msra.mxu1 %v2354_v32  ;;  %v2404_v32 = vld [vmem:[#allocation5 + $0x484] ss:$12 sps:$4 sm:$0xff]  }
  0x9c   :  { %1146 = vmatpush1.bf16.msra.mxu0 %v2275_v12  ;;  %2079 = vmatprep.subr.bf16.mxu1 %v2358_v33  ;;  %v2367_v12 = vld [vmem:[#allocation5 + $0x394] ss:$12 sps:$4 sm:$0xff]  }
  0x9d   :  { %1147 = vmatprep.subr.bf16.mxu0 %v2282_v13  ;;  %v2365_v13 = vld [vmem:[#allocation5 + $0x390] ss:$12 sps:$4 sm:$0xff]   ;;  %v2402_v33 = vld [vmem:[#allocation5 + $0x480] ss:$12 sps:$4 sm:$0xff]  }
  0x9f   :  { %2080 = vmatpush3.bf16.msra.mxu1 %v2359_v36  ;;  %v2406_v36 = vld [vmem:[#allocation7] sm:$0xff]  }
  0xa0   :  { %1148 = vmatpush1.bf16.msra.mxu0 %v2280_v16  ;;  %2081 = vmatprep.subr.bf16.mxu1 %v2363_v37  ;;  %v2377_v16 = vld [vmem:[#allocation5 + $0x3c4] ss:$12 sps:$4 sm:$0xff]  }
  0xa1   :  { %1149 = vmatprep.subr.bf16.mxu0 %v2287_v17  ;;  %v2375_v17 = vld [vmem:[#allocation5 + $0x3c0] ss:$12 sps:$4 sm:$0xff]  }
  0xa2   :  { %v2407_v37 = vld [vmem:[#allocation7 + $0x48] sm:$0xff]  }
  0xa3   :  { %2082 = vmatpush3.bf16.msra.mxu1 %v2364_v40  ;;  %v2410_v40 = vld [vmem:[#allocation7 + $0x10] sm:$0xff]  }
  0xa4   :  { %1150 = vmatpush1.bf16.msra.mxu0 %v2285_v21  ;;  %2083 = vmatprep.subr.bf16.mxu1 %v2368_v41  ;;  %v2383_v21 = vld [vmem:[#allocation5 + $0x3f0] ss:$12 sps:$4 sm:$0xff]  }
  0xa5   :  { %1151 = vmatprep.subr.bf16.mxu0 %v2292_v22  ;;  %v2389_v22 = vld [vmem:[#allocation5 + $0x40c] ss:$12 sps:$4 sm:$0xff]   ;;  %v2411_v41 = vld [vmem:[#allocation7 + $0x58] sm:$0xff]  }
  0xa7   :  { %2084 = vmatpush3.bf16.msra.mxu1 %v2369_v46  ;;  %v2416_v46 = vld [vmem:[#allocation7 + $0x28] sm:$0xff]  }
  0xa8   :  { %1152 = vmatpush1.bf16.msra.mxu0 %v2290_v26  ;;  %2085 = vmatprep.subr.bf16.mxu1 %v2373_v47  ;;  %v2395_v26 = vld [vmem:[#allocation5 + $0x43c] ss:$12 sps:$4 sm:$0xff]  }
  0xa9   :  { %1153 = vmatprep.subr.bf16.mxu0 %v2297_v27  ;;  %v2393_v27 = vld [vmem:[#allocation5 + $0x438] ss:$12 sps:$4 sm:$0xff]  }
  0xab   :  { %2086 = vmatpush3.bf16.msra.mxu1 %v2374_v50 }
  0xac   :  { %1154 = vmatpush1.bf16.msra.mxu0 %v2295_v30  ;;  %2087 = vmatprep.subr.bf16.mxu1 %v2378_v51  ;;  %v2401_v30 = vld [vmem:[#allocation5 + $0x46c] ss:$12 sps:$4 sm:$0xff]  }
  0xad   :  { %1155 = vmatprep.subr.bf16.mxu0 %v2302_v31  ;;  %v2399_v31 = vld [vmem:[#allocation5 + $0x468] ss:$12 sps:$4 sm:$0xff]  }
  0xaf   :  { %2088 = vmatpush3.bf16.msra.mxu1 %v2379_v54  ;;  %v2418_v54 = vld [vmem:[#allocation7 + $0x30] sm:$0xff]  }
  0xb0   :  { %1156 = vmatpush1.bf16.msra.mxu0 %v2300_v34  ;;  %2137 = vmatprep.subr.bf16.mxu1 %v2567_v61  ;;  %v2569_v34 = vmov 0  }
  0xb1   :  { %1157 = vmatprep.subr.bf16.mxu0 %v2307_v35  ;;  %v2405_v35 = vld [vmem:[#allocation7 + $0x40] sm:$0xff]  }
  0xb2   :  { %1373 = vmatmul.mubr.bf16.vlgmr.msra.gmra.mrb[8].mxu1 %v2662_v59 }
  0xb3   :  { %2138 = vmatpush3.bf16.msra.mxu1 %v2386_v58  ;;  %2139 = vmatprep.mubr.msk.bf16.mxu1 %vm2568_vm1, %v2567_v61 }
  0xb4   :  { %1158 = vmatpush1.bf16.msra.mxu0 %v2305_v38  ;;  %2097 = vmatprep.subr.bf16.mxu1 %v2405_v35  ;;  %v2408_v38 = vld [vmem:[#allocation7 + $0x8] sm:$0xff]  }
  0xb5   :  { %1159 = vmatprep.subr.bf16.mxu0 %v2312_v39  ;;  %v2409_v39 = vld [vmem:[#allocation7 + $0x50] sm:$0xff]   ;;  %v2426_v35 = vld [vmem:[#allocation7 + $0xa8] sm:$0xff]  }
  0xb8   :  { %1160 = vmatpush1.bf16.msra.mxu0 %v2310_v43  ;;  %v2413_v43 = vld [vmem:[#allocation7 + $0x60] sm:$0xff]  }
  0xb9   :  { %1161 = vmatprep.subr.bf16.mxu0 %v2317_v45  ;;  %v2415_v45 = vld [vmem:[#allocation7 + $0x68] sm:$0xff]  }
  0xba   :  { %2140 = vmatmul.mubr.msk.bf16.vlgmr.msra.gmra.mrb[12].mxu1 %vm1092_vm0, %v2668_v2 }
  0xbb   :  { %2098 = vmatpush3.bf16.msra.mxu1 %v2406_v36  ;;  %v2427_v36 = vld [vmem:[#allocation7 + $0xb0] sm:$0xff]  }
  0xbc   :  { %1162 = vmatpush1.bf16.msra.mxu0 %v2315_v48  ;;  %2099 = vmatprep.subr.bf16.mxu1 %v2407_v37  ;;  %v2428_v37 = vld [vmem:[#allocation7 + $0xb8] sm:$0xff]  }
  0xbd   :  { %1163 = vmatprep.subr.bf16.mxu0 %v2322_v49 }
  0xbf   :  { %2100 = vmatpush3.bf16.msra.mxu1 %v2408_v38 }
  0xc0   :  { %1164 = vmatpush1.bf16.msra.mxu0 %v2320_v52  ;;  %2101 = vmatprep.subr.bf16.mxu1 %v2409_v39  ;;  %v293_v52 = vlaneseq }
  0xc1   :  { %1165 = vmatprep.subr.bf16.mxu0 %v2327_v53  ;;  %v2417_v53 = vld [vmem:[#allocation7 + $0x70] sm:$0xff]  }
  0xc2   :  { %v294_v55 = vshrl.u32 %v293_v52, 7 }
  0xc3   :  { %2102 = vmatpush3.bf16.msra.mxu1 %v2410_v40  ;;  %v2429_v40 = vld [vmem:[#allocation8] sm:$0xff]  }
  0xc4   :  { %1166 = vmatpush1.bf16.msra.mxu0 %v2325_v56  ;;  %2103 = vmatprep.subr.bf16.mxu1 %v2411_v41  ;;  %v2419_v56 = vld [vmem:[#allocation7 + $0x78] sm:$0xff]   ;;  %v303_v58 = vsub.s32 2, %v294_v55  ;;  %v2430_v41 = vld [vmem:[#allocation8 + $0x8] sm:$0xff]  }
  0xc5   :  { %1167 = vmatprep.subr.bf16.mxu0 %v2332_v57  ;;  %v2420_v57 = vld [vmem:[#allocation7 + $0x38] sm:$0xff]  }
  0xc7   :  { %2104 = vmatpush3.bf16.msra.mxu1 %v2412_v42  ;;  %v2431_v42 = vld [vmem:[#allocation8 + $0x10] sm:$0xff]  }
  0xc8   :  { %1168 = vmatpush1.bf16.msra.mxu0 %v2330_v60  ;;  %2105 = vmatprep.subr.bf16.mxu1 %v2413_v43  ;;  %v2432_v43 = vld [vmem:[#allocation8 + $0x18] sm:$0xff]  }
  0xc9   :  { %1178 = vmatprep.subr.bf16.mxu0 %v2337_v62 }
  0xcb   :  { %1170 = vmatmul.mubr.bf16.vlgmr.msra.gmra.mrb[0].mxu0 %v2659_v24  ;;  %v2392_v24 = vld [vmem:[#allocation5 + $0x424] ss:$12 sps:$4 sm:$0xff]  }
  0xcc   :  { %1179 = vmatpush1.bf16.msra.mxu0 %v2335_v0  ;;  %1210 = vmatprep.mubr.bf16.mxu0 %v93_v44  ;;  %v2414_v44 = vld [vmem:[#allocation7 + $0x20] sm:$0xff]  }
  0xcd   :  { %1180 = vmatprep.subr.bf16.mxu0 %v2342_v1  ;;  %2106 = vmatpush3.bf16.msra.mxu1 %v2414_v44  ;;  %v2433_v44 = vld [vmem:[#allocation8 + $0x20] sm:$0xff]  }
  0xce   :  { %2107 = vmatprep.subr.bf16.mxu1 %v2415_v45  ;;  %v2434_v45 = vld [vmem:[#allocation8 + $0x28] sm:$0xff]  }
  0xd0   :  { %1181 = vmatpush1.bf16.msra.mxu0 %v2340_v3 }
  0xd1   :  { %1182 = vmatprep.subr.bf16.mxu0 %v2347_v4  ;;  %2108 = vmatpush3.bf16.msra.mxu1 %v2416_v46  ;;  %v2435_v46 = vld [vmem:[#allocation8 + $0x30] sm:$0xff]  }
  0xd2   :  { %2109 = vmatprep.subr.bf16.mxu1 %v2417_v53  ;;  %v1995_v53 = vld [vmem:[%s2721_s4] ss:$0 sm:$0xff]  ;;  %s2570_s4 = smov [#allocation10]  }
  0xd3   :  { %s1835_s30 = sshll.u32 %s2570_s4, 4  ;;  %s1836_s30 = int_to_ptr.vmem [resolvable:$true] %s1835_s30 }
  0xd4   :  { %1183 = vmatpush1.bf16.msra.mxu0 %v2345_v5  ;;  %p2534_p5 = scmp.lt.s32.totalorder %s1836_s30, %s1836_s30 }
  0xd5   :  { %1184 = vmatprep.subr.bf16.mxu0 %v2352_v6  ;;  %2110 = vmatpush3.bf16.msra.mxu1 %v2418_v54 }
  0xd6   :  { %2111 = vmatprep.subr.bf16.mxu1 %v2419_v56 }
  0xd8   :  { %1185 = vmatpush1.bf16.msra.mxu0 %v2350_v7 }
  0xd9   :  { %1186 = vmatprep.subr.bf16.mxu0 %v2357_v8  ;;  %2112 = vmatpush3.bf16.msra.mxu1 %v2420_v57 }
  0xda   :  { %2143 = vmatprep.subr.bf16.mxu1 %v2567_v61 }
  0xdc   :  { %1187 = vmatpush1.bf16.msra.mxu0 %v2355_v9 }
  0xdd   :  { %1188 = vmatprep.subr.bf16.mxu0 %v2362_v10 }
  0xe0   :  { %1189 = vmatpush1.bf16.msra.mxu0 %v2360_v11 }
  0xe1   :  { %1190 = vmatprep.subr.bf16.mxu0 %v2367_v12 }
  0xe4   :  { %1191 = vmatpush1.bf16.msra.mxu0 %v2365_v13 }
  0xe5   :  { %1192 = vmatprep.subr.bf16.mxu0 %v2372_v14 }
  0xe8   :  { %1193 = vmatpush1.bf16.msra.mxu0 %v2370_v15 }
  0xe9   :  { %1194 = vmatprep.subr.bf16.mxu0 %v2377_v16  ;;  %v295_v16 = vsub.s32 0, %v294_v55 }
  0xec   :  { %1195 = vmatpush1.bf16.msra.mxu0 %v2375_v17  ;;  %v299_v17 = vsub.s32 1, %v294_v55 }
  0xed   :  { %1196 = vmatprep.subr.bf16.mxu0 %v2382_v18 }
  0xf0   :  { %1197 = vmatpush1.bf16.msra.mxu0 %v2380_v19 }
  0xf1   :  { %1198 = vmatprep.subr.bf16.mxu0 %v2385_v20 }
  0xf4   :  { %1199 = vmatpush1.bf16.msra.mxu0 %v2383_v21 }
  0xf5   :  { %1200 = vmatprep.subr.bf16.mxu0 %v2389_v22 }
  0xf8   :  { %1201 = vmatpush1.bf16.msra.mxu0 %v2387_v23 }
  0xf9   :  { %1202 = vmatprep.subr.bf16.mxu0 %v2392_v24 }
  0xfc   :  { %1203 = vmatpush1.bf16.msra.mxu0 %v2390_v25 }
  0xfd   :  { %1204 = vmatprep.subr.bf16.mxu0 %v2395_v26 }
 0x100   :  { %1205 = vmatpush1.bf16.msra.mxu0 %v2393_v27 }
 0x101   :  { %1206 = vmatprep.subr.bf16.mxu0 %v2398_v28 }
 0x104   :  { %1207 = vmatpush1.bf16.msra.mxu0 %v2396_v29  ;;  %v2421_v29 = vld [vmem:[#allocation7 + $0x80] sm:$0xff]  }
 0x105   :  { %1208 = vmatprep.subr.bf16.mxu0 %v2401_v30 }
 0x108   :  { %1209 = vmatpush1.bf16.msra.mxu0 %v2399_v31  ;;  %v2422_v31 = vld [vmem:[#allocation7 + $0x88] sm:$0xff]  }
 0x109   :  { %1219 = vmatprep.subr.bf16.mxu0 %v2404_v32  ;;  %v2423_v32 = vld [vmem:[#allocation7 + $0x90] sm:$0xff]  }
 0x10b   :  { %1211 = vmatmul.mubr.bf16.vlgmr.msra.gmra.mrb[0].mxu0 %v2662_v59  ;;  %v291_v59 = vld [vmem:[%s2719_s2] sm:$0x7] }
 0x10c   :  { %1220 = vmatpush1.bf16.msra.mxu0 %v2402_v33  ;;  %1251 = vmatprep.mubr.bf16.mxu0 %v2569_v34  ;;  %v304_v60 = vrot.slane %v291_v59, %v303_v58  ;;  %v296_v18 = vrot.slane %v291_v59, %v295_v16  ;;  %v300_v19 = vrot.slane %v291_v59, %v299_v17  ;;  %v2424_v33 = vld [vmem:[#allocation7 + $0x98] sm:$0xff]   ;;  %v2425_v34 = vld [vmem:[#allocation7 + $0xa0] sm:$0xff]  }
 0x117   :  { %1993 = vmatmul.mubr.msk.bf16.vlgmr.msra.gmra.mrb[0].mxu0 %vm1092_vm0, %v2668_v2 }
 0x145   :  { %v2045_v47 = vpop.f32.mrb[0].mxu1 }
 0x146   :  { %v2046_v48 = vpop.f32.mrb[1].mxu1 }
 0x147   :  { %v2047_v49 = vadd.f32 %v2046_v48, %v2045_v47  ;;  %v2048_v50 = vpop.f32.mrb[2].mxu1  ;;  %v2436_v47 = vld [vmem:[#allocation8 + $0x38] sm:$0xff]  }
 0x148   :  { %v2049_v51 = vpop.f32.mrb[3].mxu1 }
 0x149   :  { %v1295_v62 = vadd.f32 %v2047_v49, %v304_v60 }
 0x165   :  { %v2067_v63 = vpop.f32.mrb[4].mxu1 }
 0x166   :  { %v2068_v0 = vpop.f32.mrb[5].mxu1 }
 0x167   :  { %v2069_v1 = vadd.f32 %v2068_v0, %v2067_v63  ;;  %v2070_v2 = vpop.f32.mrb[6].mxu1 }
 0x168   :  { %v2071_v3 = vpop.f32.mrb[7].mxu1 }
 0x169   :  { %v1335_v4 = vadd.f32 %v2069_v1, %v1295_v62 }
 0x185   :  { %v2089_v5 = vpop.f32.mrb[8].mxu1 }
 0x186   :  { %v2090_v6 = vpop.f32.mrb[9].mxu1 }
 0x187   :  { %v2091_v7 = vadd.f32 %v2090_v6, %v2089_v5  ;;  %v2092_v8 = vpop.f32.mrb[10].mxu1 }
 0x188   :  { %v2093_v9 = vpop.f32.mrb[11].mxu1 }
 0x189   :  { %v1375_v10 = vadd.f32 %v2091_v7, %v1335_v4 }
 0x18d   :  { %v1414_v11 = vpop.f32.mrb[12].mxu1 }
 0x18e   :  { %v1415_v12 = vadd.f32 %v1414_v11, %v1375_v10  ;;  %v2141_v13 = vpop.f32.mrb[13].mxu1 }
 0x18f   :  { %v1417_v14 = vpop.f32.mrb[14].mxu1 }
 0x190   :  { %v2142_v15 = vpop.f32.mrb[15].mxu1  ;;  %v1422_v38 = vmax.f32 %v1415_v12, 0.0 }
 0x192   :  { %v1425_v39 = vpack.c.bf16 %v1422_v38, %v1422_v38 }
 0x1ea   :  { %v1253_v20 = vpop.f32.mrb[0].mxu0 }
 0x1eb   :  { %v2183_v21 = vadd.f32 %v1253_v20, %v296_v18  ;;  %v1255_v22 = vpop.f32.mrb[1].mxu0 }
 0x1ec   :  { %v2184_v23 = vadd.f32 %v1255_v22, %v300_v19  ;;  %v1257_v24 = vpop.f32.mrb[2].mxu0 }
 0x1ed   :  { %v1420_v25 = vmax.f32 %v2183_v21, 0.0  ;;  %v1258_v26 = vpop.f32.mrb[3].mxu0 }
 0x1ee   :  { %v1421_v27 = vmax.f32 %v2184_v23, 0.0 }
 0x1ef   :  { %v1423_v30 = vpack.c.bf16 %v1420_v25, %v1420_v25 }
 0x1f0   :  { %v1424_v28 = vpack.c.bf16 %v1421_v27, %v1421_v27 }
 0x1f2   :  { %1657 = vmatprep.mubr.bf16.mxu1 %v1424_v28 }
 0x1f3   :  { %1658 = vmatmul.mubr.bf16.vlgmr.msra.gmra.mrb[16].mxu1 %v1423_v30 }
 0x1f4   :  { %2144 = vmatpush3.bf16.msra.mxu1 %v2421_v29  ;;  %2159 = vmatprep.mubr.msk.bf16.mxu1 %vm2568_vm1, %v2567_v61 }
 0x1f5   :  { %2145 = vmatprep.subr.bf16.mxu1 %v2567_v61 }
 0x1f8   :  { %2146 = vmatpush3.bf16.msra.mxu1 %v2422_v31 }
 0x1f9   :  { %2147 = vmatprep.subr.bf16.mxu1 %v2567_v61 }
 0x1fc   :  { %2148 = vmatpush3.bf16.msra.mxu1 %v2423_v32 }
 0x1fd   :  { %2149 = vmatprep.subr.bf16.mxu1 %v2567_v61 }
 0x200   :  { %2150 = vmatpush3.bf16.msra.mxu1 %v2424_v33 }
 0x201   :  { %2151 = vmatprep.subr.bf16.mxu1 %v2567_v61 }
 0x204   :  { %2152 = vmatpush3.bf16.msra.mxu1 %v2425_v34 }
 0x205   :  { %2153 = vmatprep.subr.bf16.mxu1 %v2567_v61 }
 0x208   :  { %2154 = vmatpush3.bf16.msra.mxu1 %v2426_v35 }
 0x209   :  { %2155 = vmatprep.subr.bf16.mxu1 %v2567_v61 }
 0x20c   :  { %2156 = vmatpush3.bf16.msra.mxu1 %v2427_v36 }
 0x20d   :  { %2157 = vmatprep.subr.bf16.mxu1 %v2567_v61 }
 0x210   :  { %2158 = vmatpush3.bf16.msra.mxu1 %v2428_v37 }
 0x211   :  { %2163 = vmatprep.subr.bf16.mxu1 %v2567_v61 }
 0x213   :  { %2160 = vmatmul.mubr.bf16.vlgmr.msra.gmra.mrb[20].mxu1 %v1425_v39 }
 0x214   :  { %2179 = vmatprep.mubr.msk.bf16.mxu1 %vm2568_vm1, %v2567_v61  ;;  %2164 = vmatpush3.bf16.msra.mxu1 %v2429_v40 }
 0x215   :  { %2165 = vmatprep.subr.bf16.mxu1 %v2567_v61 }
 0x218   :  { %2166 = vmatpush3.bf16.msra.mxu1 %v2430_v41 }
 0x219   :  { %2167 = vmatprep.subr.bf16.mxu1 %v2567_v61 }
 0x21c   :  { %2168 = vmatpush3.bf16.msra.mxu1 %v2431_v42 }
 0x21d   :  { %2169 = vmatprep.subr.bf16.mxu1 %v2567_v61 }
 0x220   :  { %2170 = vmatpush3.bf16.msra.mxu1 %v2432_v43 }
 0x221   :  { %2171 = vmatprep.subr.bf16.mxu1 %v2567_v61 }
 0x224   :  { %2172 = vmatpush3.bf16.msra.mxu1 %v2433_v44 }
 0x225   :  { %2173 = vmatprep.subr.bf16.mxu1 %v2567_v61 }
 0x228   :  { %2174 = vmatpush3.bf16.msra.mxu1 %v2434_v45 }
 0x229   :  { %2175 = vmatprep.subr.bf16.mxu1 %v2567_v61 }
 0x22c   :  { %2176 = vmatpush3.bf16.msra.mxu1 %v2435_v46 }
 0x22d   :  { %2177 = vmatprep.subr.bf16.mxu1 %v2567_v61  ;;  %v2020_v61 = vld [vmem:[%s2723_s6] ss:$0 sm:$0xff]  ;;  %s2529_s6 = scalar_lea.vmem %s1836_s30, 128 }
 0x22e   :  { %p2530_p4 = scmp.ne.s32.totalorder %s1836_s30, %s2529_s6  ;;  %p2535_p6 = scmp.lt.s32.totalorder %s2529_s6, %s2529_s6 }
 0x230   :  { %2178 = vmatpush3.bf16.msra.mxu1 %v2436_v47  ;;  %p2536_p7 = por %p2535_p6, %p2534_p5 }
 0x232   :  { %p2537_p8 = pnand %p2536_p7, %p2530_p4 }
 0x2c6   :  { %v2113_v48 = vpop.f32.mrb[16].mxu1 }
 0x2c7   :  { %v2114_v49 = vpop.f32.mrb[17].mxu1 }
 0x2c8   :  { %v2115_v50 = vadd.f32 %v2114_v49, %v2113_v48  ;;  %v2116_v51 = vpop.f32.mrb[18].mxu1 }
 0x2c9   :  { %v2117_v52 = vpop.f32.mrb[19].mxu1 }
 0x2ca   :  { %v1660_v54 = vadd.f32 %v2115_v50, %v1995_v53 }
 0x2e6   :  { %v1699_v55 = vpop.f32.mrb[20].mxu1 }
 0x2e7   :  { %v1700_v56 = vadd.f32 %v1699_v55, %v1660_v54  ;;  %v2161_v57 = vpop.f32.mrb[21].mxu1 }
 0x2e8   :  { %v1702_v58 = vpop.f32.mrb[22].mxu1 }
 0x2e9   :  { %v1705_v59 = vmax.f32 %v1700_v56, 0.0  ;;  %v2162_v60 = vpop.f32.mrb[23].mxu1 }
 0x2eb   :  { %v1706_v62 = vpack.c.bf16 %v1705_v59, %v1705_v59 }
 0x2ed   :  { %2180 = vmatmul.mubr.bf16.vlgmr.msra.gmra.mrb[24].mxu1 %v1706_v62 }
 0x3c0   :  { %v1812_v63 = vpop.f32.mrb[24].mxu1 }
 0x3c1   :  { %v1813_v0 = vadd.f32 %v2020_v61, %v1812_v63  ;;  %v2181_v1 = vpop.f32.mrb[25].mxu1 }
 0x3c2   :  { %v1815_v2 = vpop.f32.mrb[26].mxu1 }
 0x3c3   :  { %1818 = vmax.xlane.f32.xlu0 %v1813_v0  ;;  %v2182_v3 = vpop.f32.mrb[27].mxu1 }
 0x450   :  { %v1819_v4 = vpop.xlane.xlu0 %1818 }
 0x451   :  { %v1820_v5 = vsub.f32 %v1813_v0, %v1819_v4 }
 0x453   :  { %v1821_v6 = vmul.f32 1.442695, %v1820_v5 }
 0x455   :  { %2437 = vpow2.f32 %v1821_v6 }
 0x45f   :  { %v2438_v7 = vpop.eup %2437 }
 0x460   :  { %1823 = vadd.xlane.f32.xlu0 %v2438_v7 }
 0x4ed   :  { %v1824_v8 = vpop.xlane.xlu0 %1823 }
 0x4ee   :  { %2439 = vlog2.f32 %v1824_v8 }
 0x4f8   :  { %v2440_v9 = vpop.eup %2439 }
 0x4f9   :  { %v1826_v10 = vmul.f32 0.6931472, %v2440_v9 }
 0x4fb   :  { %v1827_v11 = vsub.f32 %v1820_v5, %v1826_v10 }
 0x4fd   :  { %1828 = vst [vmem:[#allocation10] sm:$0xff] %v1827_v11 }
 0x4fe   :  { %2540 = shalt.err (!%p2537_p8)
}
 0x4ff   :  { %s2541_s10 = scalar_lea.hbm %s2724_s7, 128 }
 0x500   :  { %p2542_p9 = scmp.ne.s32.totalorder %s2724_s7, %s2541_s10  ;;  %p2545_p10 = scmp.lt.u32.totalorder %s2541_s10, %s2724_s7 }
 0x502   :  { %p2547_p11 = pnand %p2545_p10, %p2542_p9 }
 0x504   :  { %2550 = shalt.err (!%p2547_p11)
}
 0x505   :  { %1838 = dma.vmem_to_hbm [thread:$0]  %s1836_s30, 128, %s2724_s7, [#allocation4]  }
 0x506   :  { %2557 = dma.done.wait [#allocation4], 128  }
 0x507   :  { %2558 = vsyncadd [#allocation4], 4294967168 }
 0x508   :  { %1842 = vsyncpa [#allocation3], 1 }
 0x509   :  { %1843 = vsyncpa [#allocation6], 1 }
 0x50a   :  { %1844 = vsyncpa [#allocation9], 1 }
 0x50b   :  { %1845 = vsyncpa [#allocation4], 1 }

</bundles_post_ra>
